<compile_context>
chip_gen: v6e
topology: v6e:2x2x1
jax: 0.10.0
libtpu: 0.0.40
codegen_flags: <defaults>
</compile_context>

<pallas_src>
import functools

import jax
import jax.numpy as jnp
from jax.experimental import pallas as pl
from jax.experimental.pallas import tpu as pltpu


def _round_up(x, m):
    return (x + m - 1) // m * m


def _vmem_capacity_bytes():
    """Best-effort physical VMEM capacity; conservative 64-MiB fallback."""
    try:
        cap = getattr(pltpu.get_tpu_info(), "vmem_capacity_bytes", None)
        if cap and int(cap) >= 32 * 1024 * 1024:
            return int(cap)
    except Exception:
        pass
    try:
        kind = jax.devices()[0].device_kind.lower()
        if any(t in kind for t in ("v5 lite", "v5e", "v5litepod", "v6", "trillium")):
            return 128 * 1024 * 1024
    except Exception:
        pass
    return 64 * 1024 * 1024          # safe for v7x (64 MiB per TensorCore)


def _match_kernel(p_ref, q_ref, w_ref, b_ref, m_ref, o_ref, *, fast):
    """One grid step handles a (Bt, ., Hp) slab of batches.

    p_ref: (Bt, Pp, Hp)   proj_p        (compute dtype)
    q_ref: (Bt, Qp, Hp)   proj_q        (compute dtype)
    w_ref: (Hp, Hp)       weight^T      (compute dtype)  -> y = x @ w
    b_ref: (1, Hp)        bias          (float32)
    m_ref: (Bt, 1, Qp)    seq-len mask  (float32)
    o_ref: (Bt, Pp, Hp)   output        (original dtype)
    """
    p3 = p_ref[...]                                   # (Bt, Pp, Hp)
    q3 = q_ref[...]                                   # (Bt, Qp, Hp)
    w = w_ref[...]                                    # (Hp, Hp)  (already W^T)
    bias = b_ref[...]                                 # (1, Hp)   f32
    mask = m_ref[...]                                 # (Bt, 1, Qp) f32

    cdt = q3.dtype
    bt, qn, hp = q3.shape
    _, pn, _ = p3.shape

    # --- trans_q = Linear(proj_q): fold (Bt, Qp) rows into one MXU matmul ----
    # (qn is a multiple of the sublane tile, so this reshape is a free view).
    q2 = q3.reshape(bt * qn, hp)
    tq2 = jnp.dot(q2, w, preferred_element_type=jnp.float32) + bias
    tq3 = tq2.reshape(bt, qn, hp).astype(cdt)         # (Bt, Qp, Hp)

    # --- att = proj_p . trans_q^T (batched, contract hidden; no transpose) ---
    att = jax.lax.dot_general(
        p3, tq3, (((2,), (2,)), ((0,), (0,))),
        preferred_element_type=jnp.float32)           # (Bt, Pp, Qp) f32

    # --- masked softmax (PyTorch masked_softmax semantics) -------------------
    logits = att * mask
    mmax = jnp.max(logits, axis=-1, keepdims=True)
    e = jnp.exp(logits - mmax)
    if fast:
        # Fused normalisation: r = e*mask / (sum(e*mask) + 1e-13*sum(e)).
        # One (Bt,Pp,Qp) pass and one reciprocal fewer than the unfused form.
        em = e * mask
        s_all = jnp.sum(e, axis=-1, keepdims=True)
        s_msk = jnp.sum(em, axis=-1, keepdims=True)
        r = em * pl.reciprocal(s_msk + 1e-13 * s_all, approx=True)
    else:
        # Bit-faithful unfused form (softmax -> mask -> renormalize).
        sm = e * pl.reciprocal(jnp.sum(e, axis=-1, keepdims=True), approx=False)
        r = sm * mask
        r = r * pl.reciprocal(jnp.sum(r, axis=-1, keepdims=True) + 1e-13,
                              approx=False)

    # --- att_vec = att_norm . proj_q (batched, contract Qp) ------------------
    att_vec = jax.lax.dot_general(
        r.astype(cdt), q3, (((2,), (1,)), ((0,), (0,))),
        preferred_element_type=jnp.float32)           # (Bt, Pp, Hp) f32

    # --- output = ReLU(Linear(att_vec)): fold (Bt, Pp) rows again ------------
    av2 = att_vec.reshape(bt * pn, hp).astype(cdt)
    out2 = jnp.dot(av2, w, preferred_element_type=jnp.float32) + bias
    o_ref[...] = jnp.maximum(out2, 0.0).reshape(bt, pn, hp).astype(o_ref.dtype)


def ssingle_match_net(proj_p, proj_q, seq_len, weight, bias, *,
                      matmul_dtype=jnp.bfloat16, batch_block=None):
    """proj_p: [B,P,H], proj_q: [B,Q,H], seq_len: [B] int32,
       weight: [H,H] (PyTorch Linear: y = x @ W^T + b), bias: [H]."""
    B, P, H = proj_p.shape
    _, Q, _ = proj_q.shape
    out_dtype = proj_p.dtype

    elt = jnp.dtype(matmul_dtype).itemsize
    out_elt = jnp.dtype(out_dtype).itemsize
    F32 = 4

    # Lane-dense hidden dim; sublane-aligned row dims so the in-kernel
    # (bt, S, Hp) -> (bt*S, Hp) reshapes are free views (no relayout copies).
    sub = 8 * max(1, 4 // elt)                        # 8 (f32) / 16 (bf16)
    Hp = _round_up(H, 128)
    Pp = _round_up(P, sub)
    Qp = _round_up(Q, sub)

    # --- generation-aware VMEM budget ----------------------------------------
    vmem_cap = _vmem_capacity_bytes()
    vmem_limit = int(vmem_cap * 0.85)                 # leave compiler headroom
    gate = max(8 * 1024 * 1024, int(vmem_cap * 0.375))  # per-step working set

    def step_bytes(b):
        io = 2 * b * (Pp + Qp) * Hp * elt             # p/q blocks, double-buffered
        io += 2 * b * Qp * F32                        # mask block
        io += 2 * b * Pp * Hp * out_elt               # output block
        wgt = 2 * (Hp * Hp * elt + Hp * F32)          # weight + bias (conservative)
        interm = (b * Qp * Hp * (F32 + elt)           # trans_q acc + cast
                  + 3 * b * Pp * Qp * F32             # att / e / r temps
                  + b * Pp * Hp * (2 * F32 + elt))    # att_vec acc + cast + f32 out
        return io + wgt + interm

    if batch_block is not None:
        bt = max(1, int(batch_block))
        while bt > 1 and step_bytes(bt) > gate:       # keep user value VMEM-safe
            bt -= 1
    else:
        rows = max(Pp, Qp)
        bt = max(1, min(B, pl.cdiv(512, rows)))       # >=512 folded MXU rows/step
        while bt > 1 and step_bytes(bt) > gate:
            bt -= 1
        while bt > 1 and pl.cdiv(B, bt) < 2:          # >=2 steps: megacore + pipeline
            bt = max(1, bt // 2)
    n_steps = pl.cdiv(B, bt)
    Bp = n_steps * bt

    # --- host-side prep: pad, pre-transpose weight, build seq-len mask -------
    if (Pp, Hp) != (P, H):
        proj_p = jnp.pad(proj_p, ((0, 0), (0, Pp - P), (0, Hp - H)))
    if (Qp, Hp) != (Q, H):
        proj_q = jnp.pad(proj_q, ((0, 0), (0, Qp - Q), (0, Hp - H)))
    if Hp != H:
        weight = jnp.pad(weight, ((0, Hp - H), (0, Hp - H)))
        bias = jnp.pad(bias, ((0, Hp - H),))
    if Bp != B:
        proj_p = jnp.pad(proj_p, ((0, Bp - B), (0, 0), (0, 0)))
        proj_q = jnp.pad(proj_q, ((0, Bp - B), (0, 0), (0, 0)))
        seq_len = jnp.pad(seq_len, ((0, Bp - B),))    # padded batches -> empty mask

    w_t = jnp.transpose(weight).astype(matmul_dtype)  # kernel computes x @ w_t
    p_c = proj_p.astype(matmul_dtype)
    q_c = proj_q.astype(matmul_dtype)
    bias2d = bias.reshape(1, Hp).astype(jnp.float32)

    # mask[b, 0, k] = 1.0 iff k < seq_len[b]; padded keys/batches get 0.
    mask = (jnp.arange(Qp, dtype=jnp.int32)[None, :]
            < seq_len[:, None]).astype(jnp.float32).reshape(Bp, 1, Qp)

    fast = jnp.dtype(matmul_dtype) != jnp.dtype(jnp.float32)
    kernel = functools.partial(_match_kernel, fast=bool(fast))

    def call(single_buffer_consts):
        cmode = ({"pipeline_mode": pl.Buffered(1)} if single_buffer_consts else {})
        grid_spec = pltpu.PrefetchScalarGridSpec(
            num_scalar_prefetch=0,
            grid=(n_steps,),
            in_specs=[
                pl.BlockSpec((bt, Pp, Hp), lambda i: (i, 0, 0)),    # proj_p block
                pl.BlockSpec((bt, Qp, Hp), lambda i: (i, 0, 0)),    # proj_q block
                pl.BlockSpec((Hp, Hp), lambda i: (0, 0), **cmode),  # weight^T (const)
                pl.BlockSpec((1, Hp), lambda i: (0, 0), **cmode),   # bias (const)
                pl.BlockSpec((bt, 1, Qp), lambda i: (i, 0, 0)),     # mask block
            ],
            out_specs=pl.BlockSpec((bt, Pp, Hp), lambda i: (i, 0, 0)),
        )
        return pl.pallas_call(
            kernel,
            out_shape=jax.ShapeDtypeStruct((Bp, Pp, Hp), out_dtype),
            grid_spec=grid_spec,
            compiler_params=pltpu.CompilerParams(
                dimension_semantics=("parallel",),
                vmem_limit_bytes=vmem_limit,
            ),
        )(p_c, q_c, w_t, bias2d, mask)

    try:
        out = call(True)      # single-buffer the constant-index weight/bias
    except Exception:
        out = call(False)     # fallback if pipeline_mode is rejected here

    if (Bp, Pp, Hp) != (B, P, H):
        # TODO(synk): for memory-bound shapes let the consumer accept the padded
        # (Bp, Pp, Hp) output instead of paying this extra HBM copy.
        out = out[:B, :P, :H]
    return out


def _reference(proj_p, proj_q, seq_len, weight, bias):
    trans_q = jnp.einsum('bqh,kh->bqk', proj_q, weight) + bias
    att = jnp.einsum('bph,bqh->bpq', proj_p, trans_q)
    col = jnp.arange(att.shape[-1])[None, None, :]
    mask = (col < seq_len[:, None, None]).astype(att.dtype)
    sm = jax.nn.softmax(att * mask, axis=-1)
    r = sm * mask
    r = r / (jnp.sum(r, axis=-1, keepdims=True) + 1e-13)
    att_vec = jnp.einsum('bpq,bqh->bph', r, proj_q)
    out = jnp.einsum('bph,kh->bpk', att_vec, weight) + bias
    return jnp.maximum(out, 0.0)


if __name__ == "__main__":
    B, P, Q, H = 2, 8, 8, 32  # batch, p-seq, q-seq, hidden_size

    key = jax.random.PRNGKey(0)
    k1, k2, k3, k4 = jax.random.split(key, 4)

    proj_p = jax.random.normal(k1, (B, P, H), dtype=jnp.float32)
    proj_q = jax.random.normal(k2, (B, Q, H), dtype=jnp.float32)
    seq_len = jnp.array([5, 8], dtype=jnp.int32)

    # Deterministic "Linear(hidden_size, hidden_size)" parameters.
    bound = 1.0 / (H ** 0.5)
    weight = jax.random.uniform(k3, (H, H), jnp.float32, -bound, bound)
    bias = jax.random.uniform(k4, (H,), jnp.float32, -bound, bound)

    # --- precise (f32) path: must match the reference tightly -----------------
    out_f32 = ssingle_match_net(proj_p, proj_q, seq_len, weight, bias,
                                matmul_dtype=jnp.float32)
    out_f32 = jax.block_until_ready(out_f32)
    ref = _reference(proj_p, proj_q, seq_len, weight, bias)
    assert out_f32.shape == ref.shape, "shape mismatch vs reference"
    assert jnp.allclose(out_f32, ref, atol=1e-4, rtol=1e-4), "f32 mismatch vs reference"

    # --- throughput (bf16) path: compare against a bf16-quantised reference ---
    out_bf16 = ssingle_match_net(proj_p, proj_q, seq_len, weight, bias,
                                 matmul_dtype=jnp.bfloat16)
    out_bf16 = jax.block_until_ready(out_bf16)
    ref_q = _reference(proj_p.astype(jnp.bfloat16).astype(jnp.float32),
                       proj_q.astype(jnp.bfloat16).astype(jnp.float32),
                       seq_len,
                       weight.astype(jnp.bfloat16).astype(jnp.float32),
                       bias)
    assert out_bf16.shape == ref_q.shape, "shape mismatch vs reference (bf16)"
    assert jnp.allclose(out_bf16, ref_q, atol=1e-1, rtol=1e-1), "bf16 mismatch vs reference"

    print("KERNEL_OK")
</pallas_src>

<mosaic_0001>
module attributes {stable_mosaic.version = 11 : i64} {
  func.func @_match_kernel(%arg0: i32, %arg1: memref<1x8x128xf32, #tpu.memory_space<vmem>>, %arg2: memref<1x8x128xf32, #tpu.memory_space<vmem>>, %arg3: memref<128x128xf32, #tpu.memory_space<vmem>>, %arg4: memref<1x128xf32, #tpu.memory_space<vmem>>, %arg5: memref<1x1x8xf32, #tpu.memory_space<vmem>>, %arg6: memref<1x8x128xf32, #tpu.memory_space<vmem>>) attributes {dimension_semantics = [#tpu.dimension_semantics<parallel>], iteration_bounds = array<i64: 2>, scalar_prefetch = 0 : i64, scratch_operands = 0 : i64, tpu.core_type = #tpu.core_type<tc>, window_params = [{transform_indices = @transform_0, window_bounds = array<i64: 1, 8, 128>}, {transform_indices = @transform_1, window_bounds = array<i64: 1, 8, 128>}, {pipeline_mode = #tpu.pipeline_mode<synchronous>, transform_indices = @transform_2, window_bounds = array<i64: 128, 128>}, {pipeline_mode = #tpu.pipeline_mode<synchronous>, transform_indices = @transform_3, window_bounds = array<i64: 1, 128>}, {transform_indices = @transform_4, window_bounds = array<i64: 1, 1, 8>}, {transform_indices = @transform_5, window_bounds = array<i64: 1, 8, 128>}]} {
    %c0 = arith.constant 0 : index
    %c0_0 = arith.constant 0 : index
    %c0_1 = arith.constant 0 : index
    %0 = vector.load %arg1[%c0, %c0_0, %c0_1] : memref<1x8x128xf32, #tpu.memory_space<vmem>>, vector<1x8x128xf32>
    %c0_2 = arith.constant 0 : index
    %c0_3 = arith.constant 0 : index
    %c0_4 = arith.constant 0 : index
    %1 = vector.load %arg2[%c0_2, %c0_3, %c0_4] : memref<1x8x128xf32, #tpu.memory_space<vmem>>, vector<1x8x128xf32>
    %c0_5 = arith.constant 0 : index
    %c0_6 = arith.constant 0 : index
    %2 = vector.load %arg3[%c0_5, %c0_6] : memref<128x128xf32, #tpu.memory_space<vmem>>, vector<128x128xf32>
    %c0_7 = arith.constant 0 : index
    %c0_8 = arith.constant 0 : index
    %3 = vector.load %arg4[%c0_7, %c0_8] : memref<1x128xf32, #tpu.memory_space<vmem>>, vector<1x128xf32>
    %c0_9 = arith.constant 0 : index
    %c0_10 = arith.constant 0 : index
    %c0_11 = arith.constant 0 : index
    %4 = vector.load %arg5[%c0_9, %c0_10, %c0_11] : memref<1x1x8xf32, #tpu.memory_space<vmem>>, vector<1x1x8xf32>
    %5 = vector.shape_cast %1 : vector<1x8x128xf32> to vector<8x128xf32>
    %cst = arith.constant dense<0.000000e+00> : vector<8x128xf32>
    %6 = tpu.matmul %5, %2, %cst {dimension_numbers = #tpu.dot_dimension_numbers<[1], [0], [0], [1], [0, 0, 1, 1], [], []>} : vector<8x128xf32>, vector<128x128xf32>, vector<8x128xf32> -> vector<8x128xf32>
    %7 = vector.broadcast %3 : vector<1x128xf32> to vector<8x128xf32>
    %8 = arith.addf %6, %7 : vector<8x128xf32>
    %9 = vector.shape_cast %8 : vector<8x128xf32> to vector<1x8x128xf32>
    %cst_12 = arith.constant dense<0.000000e+00> : vector<1x8x8xf32>
    %10 = tpu.matmul %0, %9, %cst_12 {dimension_numbers = #tpu.dot_dimension_numbers<[2], [2], [1], [1], [0, 0, 0, 1, 1, 1], [0], [0]>} : vector<1x8x128xf32>, vector<1x8x128xf32>, vector<1x8x8xf32> -> vector<1x8x8xf32>
    %11 = vector.broadcast %4 : vector<1x1x8xf32> to vector<1x8x8xf32>
    %12 = arith.mulf %10, %11 : vector<1x8x8xf32>
    %cst_13 = arith.constant dense<0xFF800000> : vector<1x8xf32>
    %13 = vector.multi_reduction <maximumf>, %12, %cst_13 [2] : vector<1x8x8xf32> to vector<1x8xf32>
    %14 = vector.shape_cast %13 : vector<1x8xf32> to vector<1x8x1xf32>
    %15 = vector.broadcast %14 : vector<1x8x1xf32> to vector<1x8x8xf32>
    %16 = arith.subf %12, %15 : vector<1x8x8xf32>
    %17 = math.exp %16 : vector<1x8x8xf32>
    %cst_14 = arith.constant dense<0.000000e+00> : vector<1x8xf32>
    %18 = vector.multi_reduction <add>, %17, %cst_14 [2] : vector<1x8x8xf32> to vector<1x8xf32>
    %19 = vector.shape_cast %18 : vector<1x8xf32> to vector<1x8x1xf32>
    %20 = tpu.reciprocal %19 : vector<1x8x1xf32> -> vector<1x8x1xf32>
    %21 = vector.broadcast %20 : vector<1x8x1xf32> to vector<1x8x8xf32>
    %22 = arith.mulf %17, %21 : vector<1x8x8xf32>
    %23 = vector.broadcast %4 : vector<1x1x8xf32> to vector<1x8x8xf32>
    %24 = arith.mulf %22, %23 : vector<1x8x8xf32>
    %cst_15 = arith.constant dense<0.000000e+00> : vector<1x8xf32>
    %25 = vector.multi_reduction <add>, %24, %cst_15 [2] : vector<1x8x8xf32> to vector<1x8xf32>
    %26 = vector.shape_cast %25 : vector<1x8xf32> to vector<1x8x1xf32>
    %cst_16 = arith.constant 9.99999982E-14 : f32
    %27 = vector.broadcast %cst_16 : f32 to vector<1x8x1xf32>
    %28 = arith.addf %26, %27 : vector<1x8x1xf32>
    %29 = tpu.reciprocal %28 : vector<1x8x1xf32> -> vector<1x8x1xf32>
    %30 = vector.broadcast %29 : vector<1x8x1xf32> to vector<1x8x8xf32>
    %31 = arith.mulf %24, %30 : vector<1x8x8xf32>
    %cst_17 = arith.constant dense<0.000000e+00> : vector<1x8x128xf32>
    %32 = tpu.matmul %31, %1, %cst_17 {dimension_numbers = #tpu.dot_dimension_numbers<[2], [1], [1], [2], [0, 0, 0, 1, 1, 2], [0], [0]>} : vector<1x8x8xf32>, vector<1x8x128xf32>, vector<1x8x128xf32> -> vector<1x8x128xf32>
    %33 = vector.shape_cast %32 : vector<1x8x128xf32> to vector<8x128xf32>
    %cst_18 = arith.constant dense<0.000000e+00> : vector<8x128xf32>
    %34 = tpu.matmul %33, %2, %cst_18 {dimension_numbers = #tpu.dot_dimension_numbers<[1], [0], [0], [1], [0, 0, 1, 1], [], []>} : vector<8x128xf32>, vector<128x128xf32>, vector<8x128xf32> -> vector<8x128xf32>
    %35 = vector.broadcast %3 : vector<1x128xf32> to vector<8x128xf32>
    %36 = arith.addf %34, %35 : vector<8x128xf32>
    %cst_19 = arith.constant 0.000000e+00 : f32
    %37 = vector.broadcast %cst_19 : f32 to vector<8x128xf32>
    %38 = arith.maximumf %36, %37 : vector<8x128xf32>
    %39 = vector.shape_cast %38 : vector<8x128xf32> to vector<1x8x128xf32>
    %c0_20 = arith.constant 0 : index
    %c0_21 = arith.constant 0 : index
    %c0_22 = arith.constant 0 : index
    %40 = vector.load %arg6[%c0_20, %c0_21, %c0_22] : memref<1x8x128xf32, #tpu.memory_space<vmem>>, vector<1x8x128xf32>
    tpu.vector_store %arg6[%c0_20, %c0_21, %c0_22], %39 {strides = array<i32>} : memref<1x8x128xf32, #tpu.memory_space<vmem>>, vector<1x8x128xf32>,
    return
  }
  func.func @transform_0(%arg0: i32) -> (i32, i32, i32) {
    %c0_i32 = arith.constant 0 : i32
    %c0_i32_0 = arith.constant 0 : i32
    %c0_i32_1 = arith.constant 0 : i32
    return %arg0, %c0_i32, %c0_i32_0 : i32, i32, i32
  }
  func.func @transform_1(%arg0: i32) -> (i32, i32, i32) {
    %c0_i32 = arith.constant 0 : i32
    %c0_i32_0 = arith.constant 0 : i32
    %c0_i32_1 = arith.constant 0 : i32
    return %arg0, %c0_i32, %c0_i32_0 : i32, i32, i32
  }
  func.func @transform_2(%arg0: i32) -> (i32, i32) {
    %c0_i32 = arith.constant 0 : i32
    %c0_i32_0 = arith.constant 0 : i32
    %c0_i32_1 = arith.constant 0 : i32
    return %c0_i32, %c0_i32_0 : i32, i32
  }
  func.func @transform_3(%arg0: i32) -> (i32, i32) {
    %c0_i32 = arith.constant 0 : i32
    %c0_i32_0 = arith.constant 0 : i32
    %c0_i32_1 = arith.constant 0 : i32
    return %c0_i32, %c0_i32_0 : i32, i32
  }
  func.func @transform_4(%arg0: i32) -> (i32, i32, i32) {
    %c0_i32 = arith.constant 0 : i32
    %c0_i32_0 = arith.constant 0 : i32
    %c0_i32_1 = arith.constant 0 : i32
    return %arg0, %c0_i32, %c0_i32_0 : i32, i32, i32
  }
  func.func @transform_5(%arg0: i32) -> (i32, i32, i32) {
    %c0_i32 = arith.constant 0 : i32
    %c0_i32_0 = arith.constant 0 : i32
    %c0_i32_1 = arith.constant 0 : i32
    return %arg0, %c0_i32, %c0_i32_0 : i32, i32, i32
  }
}

module attributes {stable_mosaic.version = 11 : i64} {
  func.func @_match_kernel(%arg0: i32, %arg1: memref<1x8x128xf32, #tpu.memory_space<vmem>>, %arg2: memref<1x8x128xf32, #tpu.memory_space<vmem>>, %arg3: memref<128x128xf32, #tpu.memory_space<vmem>>, %arg4: memref<1x128xf32, #tpu.memory_space<vmem>>, %arg5: memref<1x1x8xf32, #tpu.memory_space<vmem>>, %arg6: memref<1x8x128xf32, #tpu.memory_space<vmem>>) attributes {dimension_semantics = [#tpu.dimension_semantics<parallel>], iteration_bounds = array<i64: 2>, scalar_prefetch = 0 : i64, scratch_operands = 0 : i64, tpu.core_type = #tpu.core_type<tc>, window_params = [{transform_indices = @transform_0, window_bounds = array<i64: 1, 8, 128>}, {transform_indices = @transform_1, window_bounds = array<i64: 1, 8, 128>}, {pipeline_mode = #tpu.pipeline_mode<synchronous>, transform_indices = @transform_2, window_bounds = array<i64: 128, 128>}, {pipeline_mode = #tpu.pipeline_mode<synchronous>, transform_indices = @transform_3, window_bounds = array<i64: 1, 128>}, {transform_indices = @transform_4, window_bounds = array<i64: 1, 1, 8>}, {transform_indices = @transform_5, window_bounds = array<i64: 1, 8, 128>}]} {
    %c0 = arith.constant 0 : index
    %c0_0 = arith.constant 0 : index
    %c0_1 = arith.constant 0 : index
    %0 = vector.load %arg1[%c0, %c0_0, %c0_1] : memref<1x8x128xf32, #tpu.memory_space<vmem>>, vector<1x8x128xf32>
    %c0_2 = arith.constant 0 : index
    %c0_3 = arith.constant 0 : index
    %c0_4 = arith.constant 0 : index
    %1 = vector.load %arg2[%c0_2, %c0_3, %c0_4] : memref<1x8x128xf32, #tpu.memory_space<vmem>>, vector<1x8x128xf32>
    %c0_5 = arith.constant 0 : index
    %c0_6 = arith.constant 0 : index
    %2 = vector.load %arg3[%c0_5, %c0_6] : memref<128x128xf32, #tpu.memory_space<vmem>>, vector<128x128xf32>
    %c0_7 = arith.constant 0 : index
    %c0_8 = arith.constant 0 : index
    %3 = vector.load %arg4[%c0_7, %c0_8] : memref<1x128xf32, #tpu.memory_space<vmem>>, vector<1x128xf32>
    %c0_9 = arith.constant 0 : index
    %c0_10 = arith.constant 0 : index
    %c0_11 = arith.constant 0 : index
    %4 = vector.load %arg5[%c0_9, %c0_10, %c0_11] : memref<1x1x8xf32, #tpu.memory_space<vmem>>, vector<1x1x8xf32>
    %5 = vector.shape_cast %1 : vector<1x8x128xf32> to vector<8x128xf32>
    %cst = arith.constant dense<0.000000e+00> : vector<8x128xf32>
    %6 = tpu.matmul %5, %2, %cst {dimension_numbers = #tpu.dot_dimension_numbers<[1], [0], [0], [1], [0, 0, 1, 1], [], []>} : vector<8x128xf32>, vector<128x128xf32>, vector<8x128xf32> -> vector<8x128xf32>
    %7 = vector.broadcast %3 : vector<1x128xf32> to vector<8x128xf32>
    %8 = arith.addf %6, %7 : vector<8x128xf32>
    %9 = vector.shape_cast %8 : vector<8x128xf32> to vector<1x8x128xf32>
    %cst_12 = arith.constant dense<0.000000e+00> : vector<1x8x8xf32>
    %10 = tpu.matmul %0, %9, %cst_12 {dimension_numbers = #tpu.dot_dimension_numbers<[2], [2], [1], [1], [0, 0, 0, 1, 1, 1], [0], [0]>} : vector<1x8x128xf32>, vector<1x8x128xf32>, vector<1x8x8xf32> -> vector<1x8x8xf32>
    %11 = vector.broadcast %4 : vector<1x1x8xf32> to vector<1x8x8xf32>
    %12 = arith.mulf %10, %11 : vector<1x8x8xf32>
    %cst_13 = arith.constant dense<0xFF800000> : vector<1x8xf32>
    %13 = vector.multi_reduction <maximumf>, %12, %cst_13 [2] : vector<1x8x8xf32> to vector<1x8xf32>
    %14 = vector.shape_cast %13 : vector<1x8xf32> to vector<1x8x1xf32>
    %15 = vector.broadcast %14 : vector<1x8x1xf32> to vector<1x8x8xf32>
    %16 = arith.subf %12, %15 : vector<1x8x8xf32>
    %17 = math.exp %16 : vector<1x8x8xf32>
    %cst_14 = arith.constant dense<0.000000e+00> : vector<1x8xf32>
    %18 = vector.multi_reduction <add>, %17, %cst_14 [2] : vector<1x8x8xf32> to vector<1x8xf32>
    %19 = vector.shape_cast %18 : vector<1x8xf32> to vector<1x8x1xf32>
    %20 = tpu.reciprocal %19 : vector<1x8x1xf32> -> vector<1x8x1xf32>
    %21 = vector.broadcast %20 : vector<1x8x1xf32> to vector<1x8x8xf32>
    %22 = arith.mulf %17, %21 : vector<1x8x8xf32>
    %23 = vector.broadcast %4 : vector<1x1x8xf32> to vector<1x8x8xf32>
    %24 = arith.mulf %22, %23 : vector<1x8x8xf32>
    %cst_15 = arith.constant dense<0.000000e+00> : vector<1x8xf32>
    %25 = vector.multi_reduction <add>, %24, %cst_15 [2] : vector<1x8x8xf32> to vector<1x8xf32>
    %26 = vector.shape_cast %25 : vector<1x8xf32> to vector<1x8x1xf32>
    %cst_16 = arith.constant 9.99999982E-14 : f32
    %27 = vector.broadcast %cst_16 : f32 to vector<1x8x1xf32>
    %28 = arith.addf %26, %27 : vector<1x8x1xf32>
    %29 = tpu.reciprocal %28 : vector<1x8x1xf32> -> vector<1x8x1xf32>
    %30 = vector.broadcast %29 : vector<1x8x1xf32> to vector<1x8x8xf32>
    %31 = arith.mulf %24, %30 : vector<1x8x8xf32>
    %cst_17 = arith.constant dense<0.000000e+00> : vector<1x8x128xf32>
    %32 = tpu.matmul %31, %1, %cst_17 {dimension_numbers = #tpu.dot_dimension_numbers<[2], [1], [1], [2], [0, 0, 0, 1, 1, 2], [0], [0]>} : vector<1x8x8xf32>, vector<1x8x128xf32>, vector<1x8x128xf32> -> vector<1x8x128xf32>
    %33 = vector.shape_cast %32 : vector<1x8x128xf32> to vector<8x128xf32>
    %cst_18 = arith.constant dense<0.000000e+00> : vector<8x128xf32>
    %34 = tpu.matmul %33, %2, %cst_18 {dimension_numbers = #tpu.dot_dimension_numbers<[1], [0], [0], [1], [0, 0, 1, 1], [], []>} : vector<8x128xf32>, vector<128x128xf32>, vector<8x128xf32> -> vector<8x128xf32>
    %35 = vector.broadcast %3 : vector<1x128xf32> to vector<8x128xf32>
    %36 = arith.addf %34, %35 : vector<8x128xf32>
    %cst_19 = arith.constant 0.000000e+00 : f32
    %37 = vector.broadcast %cst_19 : f32 to vector<8x128xf32>
    %38 = arith.maximumf %36, %37 : vector<8x128xf32>
    %39 = vector.shape_cast %38 : vector<8x128xf32> to vector<1x8x128xf32>
    %c0_20 = arith.constant 0 : index
    %c0_21 = arith.constant 0 : index
    %c0_22 = arith.constant 0 : index
    %40 = vector.load %arg6[%c0_20, %c0_21, %c0_22] : memref<1x8x128xf32, #tpu.memory_space<vmem>>, vector<1x8x128xf32>
    tpu.vector_store %arg6[%c0_20, %c0_21, %c0_22], %39 {strides = array<i32>} : memref<1x8x128xf32, #tpu.memory_space<vmem>>, vector<1x8x128xf32>,
    return
  }
  func.func @transform_0(%arg0: i32) -> (i32, i32, i32) {
    %c0_i32 = arith.constant 0 : i32
    %c0_i32_0 = arith.constant 0 : i32
    %c0_i32_1 = arith.constant 0 : i32
    return %arg0, %c0_i32, %c0_i32_0 : i32, i32, i32
  }
  func.func @transform_1(%arg0: i32) -> (i32, i32, i32) {
    %c0_i32 = arith.constant 0 : i32
    %c0_i32_0 = arith.constant 0 : i32
    %c0_i32_1 = arith.constant 0 : i32
    return %arg0, %c0_i32, %c0_i32_0 : i32, i32, i32
  }
  func.func @transform_2(%arg0: i32) -> (i32, i32) {
    %c0_i32 = arith.constant 0 : i32
    %c0_i32_0 = arith.constant 0 : i32
    %c0_i32_1 = arith.constant 0 : i32
    return %c0_i32, %c0_i32_0 : i32, i32
  }
  func.func @transform_3(%arg0: i32) -> (i32, i32) {
    %c0_i32 = arith.constant 0 : i32
    %c0_i32_0 = arith.constant 0 : i32
    %c0_i32_1 = arith.constant 0 : i32
    return %c0_i32, %c0_i32_0 : i32, i32
  }
  func.func @transform_4(%arg0: i32) -> (i32, i32, i32) {
    %c0_i32 = arith.constant 0 : i32
    %c0_i32_0 = arith.constant 0 : i32
    %c0_i32_1 = arith.constant 0 : i32
    return %arg0, %c0_i32, %c0_i32_0 : i32, i32, i32
  }
  func.func @transform_5(%arg0: i32) -> (i32, i32, i32) {
    %c0_i32 = arith.constant 0 : i32
    %c0_i32_0 = arith.constant 0 : i32
    %c0_i32_1 = arith.constant 0 : i32
    return %arg0, %c0_i32, %c0_i32_0 : i32, i32, i32
  }
}

</mosaic_0001>

<bundles_post_ra>
// kernel: tpu_custom_call.1
= control target key start
LH: loop header
LB: loop body
LE: loop exit
PB: predicated region body
PF: predicated region fallthrough
CT: control target
= control target key end

     0   :  { %s1493_s0 = inlined_call_operand.hbm [shape: f32[2,8,128], index: 0, kind: input, shape index: {}]   ;;  %s1494_s1 = inlined_call_operand.hbm [shape: f32[2,8,128], index: 1, kind: input, shape index: {}]   ;;  %s1495_s2 = inlined_call_operand.hbm [shape: f32[128,128], index: 2, kind: input, shape index: {}]   ;;  %s1496_s3 = inlined_call_operand.vmem [shape: f32[1,128], index: 3, kind: input, shape index: {}]   ;;  %s1497_s4 = inlined_call_operand.vmem [shape: f32[2,1,8], index: 4, kind: input, shape index: {}]   ;;  %s1498_s5 = inlined_call_operand.hbm [shape: f32[2,8,128], index: 5, kind: output, shape index: {}]  }
   0x1   :  { %1503 = sst [smem:[#allocation14_spill]] %s1495_s2 }
   0x2   :  { %10 = vsyncpa [#allocation3], 0 }
   0x3   :  { %12 = vsyncpa [#allocation3 + $0x1], 0 }
   0x4   :  { %13 = vsyncpa [#allocation6], 0 }
   0x5   :  { %15 = vsyncpa [#allocation6 + $0x1], 0 }
   0x6   :  { %16 = vsyncpa [#allocation4], 0 }
   0x7   :  { %18 = vsyncpa [#allocation4 + $0x1], 0  ;;  %s1171_s18 = smov 0   ;;  %s1173_s19 = smov 0  }
   0x8   :  { %s1175_s20 = smov 0   ;;  %s1177_s21 = smov 0  }
   0x9 LB: > { %s1192_s22 = sadd.s32 4294967295, %s1131_s21   ;;  %s767_s23 = sadd.s32 4294967294, %s1131_s21   ;;  %s1131_s21 = sphi %s1177_s21, %s1524_s21   ;;  %s1127_s20 = sphi %s1175_s20, %s1523_s20   ;;  %s1123_s19 = sphi %s1173_s19, %s1522_s19   ;;  %s1119_s18 = sphi %s1171_s18, %s1521_s18  }
   0xa   : > { %p44_p0 = scmp.ne.s32.totalorder %s1123_s19, %s1119_s18  ;;  %p1499_p1 = scmp.eq.s32.totalorder %s1192_s22, 0 }
   0xb   : > { %p168_p3 = scmp.eq.s32.totalorder %s767_s23, 1  ;;  %p768_p5 = scmp.ge.s32.totalorder %s1131_s21, 1 }
   0xc   : > { %p1201_p4 = por %p1499_p1, %p44_p0  ;;  %p175_p7 = scmp.lt.s32.totalorder %s1131_s21, 3 }
   0xd   : > { %p1206_p6 = por %p168_p3, %p44_p0  ;;  %s1133_s27 = smov [#allocation7]  }
   0xe   : > { %s1504_s24 = scalar_select %p1201_p4, 1, 0 }
   0xf   : > { %s1505_s25 = scalar_select %p1206_p6, 1, 0 }
  0x10   : > { %p1211_p8 = pnand %p768_p5, %p175_p7  ;;  %s187_s28 = sshll.u32 %s1133_s27, 4  ;;  %s188_s28 = int_to_ptr.vmem [resolvable:$true] %s187_s28 }
  0x11   : > { %s1225_s30 = sadd.s32 1, %s1131_s21   ;;  %s31_s6 = sadd.s32 1, %s1127_s20 }
  0x12   : > { %s1506_s26 = scalar_select %p1211_p8, 1, 0 }
  0x13   : > { %p915_p9 = pneg %p1211_p8  ;;  %s28_s7 = ssub.s32 %s1131_s21, %s1225_s30 }
  0x14   : > { %s988_s8 = scalar_lea.vmem %s188_s28, 2048  ;;  %p996_p5 = scmp.lt.s32.totalorder %s188_s28, %s188_s28 }
  0x15   : > { %p1220_p11 = pnand %p915_p9, %p1499_p1  ;;  %p989_p13 = scmp.ne.s32.totalorder %s188_s28, %s988_s8 }
  0x16   : > { %p997_p7 = scmp.lt.s32.totalorder %s988_s8, %s988_s8 }
  0x17   : > { %p979_p12 = pneg %p1220_p11 }
  0x18   : > { %p998_p10 = por %p997_p7, %p996_p5 }
  0x19   : > { %p991_p0 = pnand %p989_p13, %p979_p12 }
  0x1b   : > { %p992_p3 = pneg %p991_p0 }
  0x1d   : > { %p999_p2 = pnand %p998_p10, %p992_p3 }
  0x1f   : > { %1002 = shalt.err (!%p999_p2)
}
  0x20   : > { %s1134_s9 = smov 128   ;;  %s1135_s10 = smov 8  }
  0x21   : > { %s1508_s2 = sld [smem:[#allocation14_spill]]  ;;  %p29_p9 = scmp.eq.s32.totalorder %s28_s7, 0 }
  0x22   : > { %p38_p12 = scmp.ne.s32.totalorder %s1127_s20, %s1123_s19  ;;  %p39_p10 = scmp.eq.s32.totalorder %s1131_s21, 0 }
  0x23   : > { %p931_p2 = scmp.lt.s32.totalorder %s1131_s21, 2  ;;  %p1510_p0 = scmp.eq.s32.totalorder %s1192_s22, 1 }
  0x24   : > { %s1242_s13 = scalar_select %p29_p9, %s1127_s20, %s31_s6  }
  0x25   : > { %p40_p13 = por %p39_p10, %p38_p12  ;;  %p1246_p3 = por %p1510_p0, %p38_p12 }
  0x26   : > { %1509 = sst [smem:[#allocation13_spill]] %s1242_s13  ;;  %s204_s15 = sand.u32 1, %s1127_s20  }
  0x27   : > { %918 = dma.hbm_to_vmem [thread:$0]  (!%p1220_p11), %s1508_s2, 2048, %s188_s28, [#allocation6], %s1134_s9, %s1134_s9, %s1135_s10  }
  0x28   : > { %s1511_s14 = scalar_select %p1246_p3, 1, 0 }
  0x29   : > { %s772_s16 = sshll.u32 %s1131_s21, 7  ;;  %s1252_s17 = sshll.u32 %s204_s15, 3 }
  0x2a   : > { %s1257_s28 = scalar_lea.hbm %s1493_s0, %s772_s16  ;;  %s208_s29 = scalar_lea.vmem [#allocation2], %s1252_s17 }
  0x2b   : > { %s215_s6 = sshll.u32 %s208_s29, 4  ;;  %p1260_p11 = pnand %p931_p2, %p40_p13  ;;  %s216_s6 = int_to_ptr.vmem [resolvable:$true] %s215_s6 }
  0x2c   : > { %s1267_s10 = scalar_lea.hbm %s1494_s1, %s772_s16  ;;  %s205_s11 = scalar_lea.sflag [#allocation3], %s204_s15 }
  0x2d   : > { %s1003_s12 = scalar_lea.hbm %s1257_s28, 128  ;;  %p1005_p7 = pneg %p1260_p11 }
  0x2e   : > { %p1004_p5 = scmp.ne.s32.totalorder %s1257_s28, %s1003_s12  ;;  %s1008_s29 = scalar_lea.hbm %s1493_s0, 256 }
  0x2f   : > { %p1009_p10 = scmp.lt.s32.totalorder %s1257_s28, %s1493_s0  ;;  %p1010_p2 = scmp.lt.s32.totalorder %s1008_s29, %s1003_s12 }
  0x30   : > { %p1006_p9 = pnand %p1005_p7, %p1004_p5 }
  0x31   : > { %p1011_p13 = por %p1010_p2, %p1009_p10 }
  0x32   : > { %p1007_p12 = pneg %p1006_p9 }
  0x34   : > { %p1012_p0 = pnand %p1011_p13, %p1007_p12 }
  0x36   : > { %1015 = shalt.err (!%p1012_p0)
}
  0x37   : > { %s1016_s15 = scalar_lea.vmem %s216_s6, 128  ;;  %s1136_s16 = smov [#allocation2]  }
  0x38   : > { %p1017_p1 = scmp.ne.s32.totalorder %s216_s6, %s1016_s15  ;;  %s1021_s8 = sshll.u32 %s1136_s16, 4  ;;  %s1022_s8 = int_to_ptr.vmem [resolvable:$false] %s1021_s8 }
  0x39   : > { %s1023_s9 = scalar_lea.vmem %s1022_s8, 256  ;;  %p1024_p9 = scmp.lt.s32.totalorder %s216_s6, %s1022_s8 }
  0x3a   : > { %p1019_p6 = pnand %p1017_p1, %p1005_p7  ;;  %p1025_p3 = scmp.lt.s32.totalorder %s1023_s9, %s1016_s15 }
  0x3c   : > { %p1020_p5 = pneg %p1019_p6  ;;  %p1026_p4 = por %p1025_p3, %p1024_p9 }
  0x3e   : > { %p1027_p8 = pnand %p1026_p4, %p1020_p5 }
  0x40   : > { %1030 = shalt.err (!%p1027_p8)
}
  0x41   : > { %922 = dma.hbm_to_vmem [thread:$0]  (!%p1260_p11), %s1257_s28, 128, %s216_s6, %s205_s11  }
  0x42   : > { %s222_s2 = sand.u32 1, %s1131_s21   ;;  %s226_s13 = scalar_lea.vmem [#allocation5], %s1252_s17 }
  0x43   : > { %s233_s12 = sshll.u32 %s226_s13, 4  ;;  %s223_s23 = scalar_lea.sflag [#allocation6], %s222_s2  ;;  %s234_s12 = int_to_ptr.vmem [resolvable:$true] %s233_s12 }
  0x44   : > { %s1031_s27 = scalar_lea.hbm %s1267_s10, 128  ;;  %s1036_s16 = scalar_lea.hbm %s1494_s1, 256 }
  0x45   : > { %p1032_p1 = scmp.ne.s32.totalorder %s1267_s10, %s1031_s27  ;;  %p1037_p8 = scmp.lt.s32.totalorder %s1267_s10, %s1494_s1 }
  0x46   : > { %p1038_p3 = scmp.lt.s32.totalorder %s1036_s16, %s1031_s27 }
  0x47   : > { %p1034_p4 = pnand %p1032_p1, %p1005_p7 }
  0x48   : > { %p1039_p12 = por %p1038_p3, %p1037_p8 }
  0x49   : > { %p1035_p6 = pneg %p1034_p4 }
  0x4b   : > { %p1040_p10 = pnand %p1039_p12, %p1035_p6 }
  0x4d   : > { %1043 = shalt.err (!%p1040_p10)
}
  0x4e   : > { %s1044_s17 = scalar_lea.vmem %s234_s12, 128  ;;  %s1137_s28 = smov [#allocation5]  }
  0x4f   : > { %p1045_p2 = scmp.ne.s32.totalorder %s234_s12, %s1044_s17  ;;  %s1049_s6 = sshll.u32 %s1137_s28, 4  ;;  %s1050_s6 = int_to_ptr.vmem [resolvable:$false] %s1049_s6 }
  0x50   : > { %s1051_s11 = scalar_lea.vmem %s1050_s6, 256  ;;  %p1052_p5 = scmp.lt.s32.totalorder %s234_s12, %s1050_s6 }
  0x51   : > { %p1047_p13 = pnand %p1045_p2, %p1005_p7  ;;  %p1053_p9 = scmp.lt.s32.totalorder %s1051_s11, %s1044_s17 }
  0x53   : > { %p1048_p0 = pneg %p1047_p13  ;;  %p1054_p1 = por %p1053_p9, %p1052_p5 }
  0x55   : > { %p1055_p4 = pnand %p1054_p1, %p1048_p0 }
  0x57   : > { %1058 = shalt.err (!%p1055_p4)
}
  0x58   : > { %925 = dma.hbm_to_vmem [thread:$0]  (!%p1260_p11), %s1267_s10, 128, %s234_s12, %s223_s23  }
  0x59   : > { %p1513_p6 = scmp.ne.s32.totalorder %s1506_s26, 0 }
  0x5a   : > { %s1312_s2 = sand.u32 (!%p1513_p6), 1, %s1123_s19   ;;  %p1514_p7 = scmp.ne.s32.totalorder (!%p1513_p6), %s1504_s24, 0 }
  0x5b   : > { %248 = sbr.rel (%p1513_p6) target bundleno = 1404 (0x57c), region = 40  ;;  %s1315_s13 = sshll.u32 (!%p1513_p6), %s1312_s2, 3 }
  0x5c   : > { %s251_s27 = scalar_lea.sflag (!%p1513_p6), [#allocation3], %s1312_s2  ;;  %s254_s29 = scalar_lea.vmem (!%p1513_p6), [#allocation2], %s1315_s13 }
  0x60   : > { %1102 = dma.done.wait (%p1514_p7), %s251_s27, 128  }
  0x61   : > { %1104 = vsyncadd (%p1514_p7), %s251_s27, 4294967168  ;;  %s259_s26 = sand.u32 1, %s1192_s22   ;;  %s263_s10 = scalar_lea.vmem [#allocation5], %s1315_s13 }
  0x62   : > { %s260_s7 = scalar_lea.sflag [#allocation6], %s259_s26 }
  0x63   : > { %1106 = dma.done.wait (%p1514_p7), %s260_s7, 128  }
  0x64   : > { %1108 = vsyncadd (%p1514_p7), %s260_s7, 4294967168  ;;  %p1515_p11 = scmp.eq.s32.totalorder %s1192_s22, 0 }
  0x66   : > { %1110 = dma.done.wait (%p1515_p11), [#allocation6], 2048   ;;  %p1516_p8 = pmov %p1515_p11 }
  0x67   : > { %v1138_v0 = vmov 0.0   ;;  %vm1139_vm0 = vmmov 0   ;;  %v1339_v1 = vld [vmem:[#allocation7 + $0x78] sm:$0xff]  ;;  %v1341_v2 = vld [vmem:[#allocation7 + $0x70] sm:$0xff]  ;;  %v1345_v3 = vld [vmem:[#allocation7 + $0x68] sm:$0xff]  ;;  %p302_p3 = scmp.lt.s32.totalorder %s1192_s22, 1 }
  0x68   : > { %1112 = vsyncadd (%p1516_p8), [#allocation6], 4294965248  ;;  %825 = vmatprep.subr.mxu0 %v1138_v0  ;;  %857 = vmatprep.mubr.msk.f32.mxu0 %vm1139_vm0, %v1138_v0  ;;  %v1349_v4 = vld [vmem:[#allocation7 + $0x60] sm:$0xff]  ;;  %v306_v5 = vld [vmem:[%s263_s10] sm:$0xff]  ;;  %vm478_vm1 = vcmask 64512   ;;  %s784_s9 = sshll.u32 %s1192_s22, 7 }
  0x69   : > { %865 = vmatprep.subr.mxu1 %v1138_v0  ;;  %867 = vmatprep.mubr.msk.f32.mxu1 %vm1139_vm0, %v1138_v0  ;;  %v1353_v6 = vld [vmem:[#allocation7 + $0x58] sm:$0xff]  ;;  %v1358_v7 = vld [vmem:[#allocation7 + $0x50] sm:$0xff]  ;;  %v1362_v8 = vld [vmem:[#allocation7 + $0x48] sm:$0xff]  ;;  %s303_s23 = scalar_select %p302_p3, %s1192_s22, 1 }
  0x6a   : > { %826 = vmatpush3.msra.mxu0 %v1339_v1  ;;  %866 = vmatpush3.msra.mxu1 %v306_v5  ;;  %v1366_v9 = vld [vmem:[#allocation7 + $0x40] sm:$0xff]  ;;  %v1370_v10 = vld [vmem:[#allocation7 + $0x38] sm:$0xff]  ;;  %v1374_v11 = vld [vmem:[#allocation7 + $0x30] sm:$0xff]  ;;  %s301_s17 = scalar_lea.vmem [#allocation8], %s1315_s13  ;;  %s654_s27 = scalar_lea.hbm %s1498_s5, %s784_s9 }
  0x6b   : > { %827 = vmatprep.subr.mxu0 %v1138_v0  ;;  %870 = vmatprep.subr.mxu1 %v1138_v0  ;;  %v1378_v12 = vld [vmem:[#allocation7 + $0x28] sm:$0xff]  ;;  %v1382_v13 = vld [vmem:[#allocation7 + $0x20] sm:$0xff]  ;;  %v1386_v14 = vld [vmem:[#allocation7 + $0x18] sm:$0xff]  ;;  %s304_s8 = scalar_lea.vmem %s1497_s4, %s303_s23  ;;  %s656_s28 = sshll.u32 %s301_s17, 4  ;;  %s657_s28 = int_to_ptr.vmem [resolvable:$true] %s656_s28 }
  0x6c   : > { %828 = vmatpush3.msra.mxu0 %v1341_v2  ;;  %v1390_v15 = vld [vmem:[#allocation7 + $0x10] sm:$0xff]  ;;  %v1394_v16 = vld [vmem:[#allocation7 + $0x8] sm:$0xff]  ;;  %v1398_v17 = vld [vmem:[#allocation7] sm:$0xff]  ;;  %s1059_s26 = scalar_lea.vmem %s657_s28, 128  ;;  %p1517_p10 = scmp.ne.s32.totalorder %s1511_s14, 0 }
  0x6d   : > { %829 = vmatprep.subr.mxu0 %v1138_v0  ;;  %v1409_v18 = vld [vmem:[%s1496_s3] ss:$0 sm:$0xff]  ;;  %p1060_p12 = scmp.ne.s32.totalorder %s657_s28, %s1059_s26  ;;  %s1140_s7 = smov [#allocation8]  }
  0x6e   : > { %830 = vmatpush3.msra.mxu0 %v1345_v3  ;;  %v305_v22 = vld [vmem:[%s254_s29] sm:$0xff]  ;;  %s643_s29 = scalar_lea.sflag [#allocation4], %s1312_s2  ;;  %s1063_s22 = sshll.u32 %s1140_s7, 4  ;;  %s1064_s22 = int_to_ptr.vmem [resolvable:$false] %s1063_s22 }
  0x6f   : > { %831 = vmatprep.subr.mxu0 %v1138_v0  ;;  %v781_v23 = vld [vmem:[%s304_s8] ss:$0 sm:$0xff]  ;;  %p1061_p2 = pnand %p1060_p12, %p1517_p10  ;;  %s1065_s13 = scalar_lea.vmem %s1064_s22, 256 }
  0x70   : > { %832 = vmatpush3.msra.mxu0 %v1349_v4  ;;  %p1066_p0 = scmp.lt.s32.totalorder %s657_s28, %s1064_s22  ;;  %p1067_p5 = scmp.lt.s32.totalorder %s1065_s13, %s1059_s26 }
  0x71   : > { %833 = vmatprep.subr.mxu0 %v1138_v0  ;;  %p1062_p13 = pneg %p1061_p2 }
  0x72   : > { %834 = vmatpush3.msra.mxu0 %v1353_v6  ;;  %p1068_p9 = por %p1067_p5, %p1066_p0 }
  0x73   : > { %835 = vmatprep.subr.mxu0 %v1138_v0 }
  0x74   : > { %836 = vmatpush3.msra.mxu0 %v1358_v7  ;;  %p1069_p1 = pnand %p1068_p9, %p1062_p13 }
  0x75   : > { %837 = vmatprep.subr.mxu0 %v1138_v0 }
  0x76   : > { %838 = vmatpush3.msra.mxu0 %v1362_v8 }
  0x77   : > { %839 = vmatprep.subr.mxu0 %v1138_v0 }
  0x78   : > { %840 = vmatpush3.msra.mxu0 %v1366_v9 }
  0x79   : > { %841 = vmatprep.subr.mxu0 %v1138_v0 }
  0x7a   : > { %842 = vmatpush3.msra.mxu0 %v1370_v10 }
  0x7b   : > { %843 = vmatprep.subr.mxu0 %v1138_v0 }
  0x7c   : > { %844 = vmatpush3.msra.mxu0 %v1374_v11 }
  0x7d   : > { %845 = vmatprep.subr.mxu0 %v1138_v0 }
  0x7e   : > { %846 = vmatpush3.msra.mxu0 %v1378_v12 }
  0x7f   : > { %847 = vmatprep.subr.mxu0 %v1138_v0 }
  0x80   : > { %848 = vmatpush3.msra.mxu0 %v1382_v13 }
  0x81   : > { %849 = vmatprep.subr.mxu0 %v1138_v0 }
  0x82   : > { %850 = vmatpush3.msra.mxu0 %v1386_v14 }
  0x83   : > { %851 = vmatprep.subr.mxu0 %v1138_v0 }
  0x84   : > { %852 = vmatpush3.msra.mxu0 %v1390_v15 }
  0x85   : > { %853 = vmatprep.subr.mxu0 %v1138_v0 }
  0x86   : > { %854 = vmatpush3.msra.mxu0 %v1394_v16 }
  0x87   : > { %855 = vmatprep.subr.mxu0 %v1138_v0 }
  0x88   : > { %856 = vmatpush3.msra.mxu0 %v1398_v17 }
  0x89   : > { %858 = vmatmul.mubr.f32.vlgmr.msra.gmra.mxu0 %v306_v5  ;;  %860 = vmatprep.subr.mxu0 %v1138_v0 }
  0x8a   : > { %862 = vmatprep.mubr.msk.f32.mxu0 %vm1139_vm0, %v1138_v0 }
 0x149   : > { %v397_v19 = vpop.f32.mrf.mxu0 }
 0x14a   : > { %v398_v20 = vadd.f32 %v1409_v18, %v397_v19 }
 0x14b   : > { %v859_v21 = vpop.f32.mrf.mxu0 }
 0x14c   : > { %861 = vmatpush3.xpose.msra.mxu0 %v398_v20 }
 0x14f   : > { %863 = vmatmul.mubr.f32.vlgmr.msra.gmra.mxu0 %v305_v22 }
 0x20f   : > { %v467_v24 = vpop.f32.mrf.mxu0 }
 0x210   : > { %v477_v25 = vmul.f32 %v781_v23, %v467_v24 }
 0x211   : > { %v864_v26 = vpop.f32.mrf.mxu0 }
 0x212   : > { %v479_v27 = vsel %vm478_vm1, %v477_v25, -inf }
 0x213   : > { %480 = vmax.xlane.f32.xlu0 %v479_v27 }
 0x29c   : > { %v481_v28 = vpop.xlane.xlu0 %480 }
 0x29d   : > { %v482_v29 = vsub.f32 %v477_v25, %v481_v28 }
 0x29f   : > { %v483_v30 = vmul.f32 1.442695, %v482_v29 }
 0x2a1   : > { %971 = vpow2.f32 %v483_v30 }
 0x2ae   : > { %v972_v31 = vpop.eup %971 }
 0x2af   : > { %v485_v32 = vsel %vm478_vm1, %v972_v31, 0.0 }
 0x2b0   : > { %486 = vadd.xlane.f32.xlu0 %v485_v32 }
 0x339   : > { %v487_v33 = vpop.xlane.xlu0 %486 }
 0x33a   : > { %973 = vrcp.f32 %v487_v33 }
 0x347   : > { %v974_v34 = vpop.eup %973 }
 0x348   : > { %v489_v35 = vmul.f32 %v974_v34, %v972_v31 }
 0x34a   : > { %v490_v36 = vmul.f32 %v781_v23, %v489_v35 }
 0x34c   : > { %v491_v37 = vsel %vm478_vm1, %v490_v36, 0.0 }
 0x34d   : > { %492 = vadd.xlane.f32.xlu1 %v491_v37 }
 0x3d6   : > { %v493_v38 = vpop.xlane.xlu1 %492 }
 0x3d7   : > { %v494_v39 = vadd.f32 1e-13, %v493_v38 }
 0x3d9   : > { %975 = vrcp.f32 %v494_v39 }
 0x3e6   : > { %v976_v40 = vpop.eup %975 }
 0x3e7   : > { %v496_v41 = vmul.f32 %v976_v40, %v490_v36 }
 0x3e9   : > { %868 = vmatmul.mubr.msk.f32.vlgmr.msra.gmra.mxu1 %vm478_vm1, %v496_v41 }
 0x3ea   : > { %871 = vmatpush3.msra.mxu1 %v1339_v1  ;;  %902 = vmatprep.mubr.msk.f32.mxu1 %vm1139_vm0, %v1138_v0 }
 0x3eb   : > { %872 = vmatprep.subr.mxu1 %v1138_v0 }
 0x3ec   : > { %873 = vmatpush3.msra.mxu1 %v1341_v2 }
 0x3ed   : > { %874 = vmatprep.subr.mxu1 %v1138_v0 }
 0x3ee   : > { %875 = vmatpush3.msra.mxu1 %v1345_v3 }
 0x3ef   : > { %876 = vmatprep.subr.mxu1 %v1138_v0 }
 0x3f0   : > { %877 = vmatpush3.msra.mxu1 %v1349_v4 }
 0x3f1   : > { %878 = vmatprep.subr.mxu1 %v1138_v0 }
 0x3f2   : > { %879 = vmatpush3.msra.mxu1 %v1353_v6 }
 0x3f3   : > { %880 = vmatprep.subr.mxu1 %v1138_v0 }
 0x3f4   : > { %881 = vmatpush3.msra.mxu1 %v1358_v7 }
 0x3f5   : > { %882 = vmatprep.subr.mxu1 %v1138_v0 }
 0x3f6   : > { %883 = vmatpush3.msra.mxu1 %v1362_v8 }
 0x3f7   : > { %884 = vmatprep.subr.mxu1 %v1138_v0 }
 0x3f8   : > { %885 = vmatpush3.msra.mxu1 %v1366_v9 }
 0x3f9   : > { %886 = vmatprep.subr.mxu1 %v1138_v0 }
 0x3fa   : > { %887 = vmatpush3.msra.mxu1 %v1370_v10 }
 0x3fb   : > { %888 = vmatprep.subr.mxu1 %v1138_v0 }
 0x3fc   : > { %889 = vmatpush3.msra.mxu1 %v1374_v11 }
 0x3fd   : > { %890 = vmatprep.subr.mxu1 %v1138_v0 }
 0x3fe   : > { %891 = vmatpush3.msra.mxu1 %v1378_v12 }
 0x3ff   : > { %892 = vmatprep.subr.mxu1 %v1138_v0 }
 0x400   : > { %893 = vmatpush3.msra.mxu1 %v1382_v13 }
 0x401   : > { %894 = vmatprep.subr.mxu1 %v1138_v0 }
 0x402   : > { %895 = vmatpush3.msra.mxu1 %v1386_v14 }
 0x403   : > { %896 = vmatprep.subr.mxu1 %v1138_v0 }
 0x404   : > { %897 = vmatpush3.msra.mxu1 %v1390_v15 }
 0x405   : > { %898 = vmatprep.subr.mxu1 %v1138_v0 }
 0x406   : > { %899 = vmatpush3.msra.mxu1 %v1394_v16 }
 0x407   : > { %900 = vmatprep.subr.mxu1 %v1138_v0 }
 0x408   : > { %901 = vmatpush3.msra.mxu1 %v1398_v17 }
 0x4a9   : > { %v566_v42 = vpop.f32.mrf.mxu1 }
 0x4aa   : > { %903 = vmatmul.mubr.f32.vlgmr.msra.gmra.mxu1 %v566_v42 }
 0x4ab   : > { %v869_v43 = vpop.f32.mrf.mxu1 }
 0x56a   : > { %v636_v44 = vpop.f32.mrf.mxu1 }
 0x56b   : > { %v637_v45 = vadd.f32 %v1409_v18, %v636_v44 }
 0x56c   : > { %v904_v46 = vpop.f32.mrf.mxu1 }
 0x56d   : > { %v640_v47 = vmax.f32 %v637_v45, 0.0 }
 0x56f   : > { %641 = vst [vmem:[%s301_s17] sm:$0xff] %v640_v47 }
 0x570   : > { %1072 = shalt.err (!%p1069_p1)
}
 0x571   : > { %s1073_s10 = scalar_lea.hbm %s654_s27, 128  ;;  %s1077_s12 = scalar_lea.hbm %s1498_s5, 256 }
 0x572   : > { %p1074_p4 = scmp.ne.s32.totalorder %s654_s27, %s1073_s10  ;;  %p1078_p11 = scmp.lt.s32.totalorder %s654_s27, %s1498_s5 }
 0x573   : > { %p1079_p8 = scmp.lt.s32.totalorder %s1077_s12, %s1073_s10 }
 0x574   : > { %p1075_p6 = pnand %p1074_p4, %p1517_p10 }
 0x575   : > { %p1080_p3 = por %p1079_p8, %p1078_p11 }
 0x576   : > { %p1076_p7 = pneg %p1075_p6 }
 0x578   : > { %p1081_p12 = pnand %p1080_p3, %p1076_p7 }
 0x57a   : > { %1084 = shalt.err (!%p1081_p12)
}
 0x57b   : > { %913 = dma.vmem_to_hbm [thread:$0]  (%p1517_p10), %s657_s28, 128, %s654_s27, %s643_s29  }
 0x57c PF: > { %s668_s16 = sand.u32 1, %s1119_s18   ;;  %p1518_p2 = scmp.ne.s32.totalorder %s1505_s25, 0 }
 0x57d   : > { %p1519_p13 = scmp.ge.s32.totalorder %s1131_s21, 2  ;;  %s669_s8 = scalar_lea.sflag [#allocation4], %s668_s16 }
 0x57f   : > { %p927_p0 = pnand %p1519_p13, %p1518_p2 }
 0x581   : > { %p928_p5 = pneg %p927_p0 }
 0x583   : > { %1114 = dma.done.wait (%p928_p5), %s669_s8, 128  }
 0x584   : > { %1116 = vsyncadd (%p928_p5), %s669_s8, 4294967168  ;;  %s1520_s9 = sld [smem:[#allocation13_spill]]  ;;  %p21_p9 = scmp.ge.s32.totalorder %s1225_s30, 4  }
 0x585   : > { %s1521_s18 = smov %s1123_s19  ;;  %s1522_s19 = smov %s1127_s20 }
 0x586   : > { %s1524_s21 = smov %s1225_s30  ;;  %23 = sbr.rel (!%p21_p9) target bundleno = 9 (0x9), region = 105 }
 0x58a   : > { %s1523_s20 = smov %s1520_s9 }
 0x58b   :  { %674 = vsyncpa [#allocation3], 1 }
 0x58c   :  { %676 = vsyncpa [#allocation3 + $0x1], 1 }
 0x58d   :  { %677 = vsyncpa [#allocation6], 1 }
 0x58e   :  { %679 = vsyncpa [#allocation6 + $0x1], 1 }
 0x58f   :  { %680 = vsyncpa [#allocation4], 1 }
 0x590   :  { %682 = vsyncpa [#allocation4 + $0x1], 1 }

// kernel: tpu_custom_call.1
= control target key start
LH: loop header
LB: loop body
LE: loop exit
PB: predicated region body
PF: predicated region fallthrough
CT: control target
= control target key end

     0   :  { %s1493_s0 = inlined_call_operand.hbm [shape: f32[2,8,128], index: 0, kind: input, shape index: {}]   ;;  %s1494_s1 = inlined_call_operand.hbm [shape: f32[2,8,128], index: 1, kind: input, shape index: {}]   ;;  %s1495_s2 = inlined_call_operand.hbm [shape: f32[128,128], index: 2, kind: input, shape index: {}]   ;;  %s1496_s3 = inlined_call_operand.vmem [shape: f32[1,128], index: 3, kind: input, shape index: {}]   ;;  %s1497_s4 = inlined_call_operand.vmem [shape: f32[2,1,8], index: 4, kind: input, shape index: {}]   ;;  %s1498_s5 = inlined_call_operand.hbm [shape: f32[2,8,128], index: 5, kind: output, shape index: {}]  }
   0x1   :  { %1503 = sst [smem:[#allocation14_spill]] %s1495_s2 }
   0x2   :  { %10 = vsyncpa [#allocation3], 0 }
   0x3   :  { %12 = vsyncpa [#allocation3 + $0x1], 0 }
   0x4   :  { %13 = vsyncpa [#allocation6], 0 }
   0x5   :  { %15 = vsyncpa [#allocation6 + $0x1], 0 }
   0x6   :  { %16 = vsyncpa [#allocation4], 0 }
   0x7   :  { %18 = vsyncpa [#allocation4 + $0x1], 0  ;;  %s1171_s18 = smov 0   ;;  %s1173_s19 = smov 0  }
   0x8   :  { %s1175_s20 = smov 0   ;;  %s1177_s21 = smov 0  }
   0x9 LB: > { %s1192_s22 = sadd.s32 4294967295, %s1131_s21   ;;  %s767_s23 = sadd.s32 4294967294, %s1131_s21   ;;  %s1131_s21 = sphi %s1177_s21, %s1524_s21   ;;  %s1127_s20 = sphi %s1175_s20, %s1523_s20   ;;  %s1123_s19 = sphi %s1173_s19, %s1522_s19   ;;  %s1119_s18 = sphi %s1171_s18, %s1521_s18  }
   0xa   : > { %p44_p0 = scmp.ne.s32.totalorder %s1123_s19, %s1119_s18  ;;  %p1499_p1 = scmp.eq.s32.totalorder %s1192_s22, 0 }
   0xb   : > { %p168_p3 = scmp.eq.s32.totalorder %s767_s23, 1  ;;  %p768_p5 = scmp.ge.s32.totalorder %s1131_s21, 1 }
   0xc   : > { %p1201_p4 = por %p1499_p1, %p44_p0  ;;  %p175_p7 = scmp.lt.s32.totalorder %s1131_s21, 3 }
   0xd   : > { %p1206_p6 = por %p168_p3, %p44_p0  ;;  %s1133_s27 = smov [#allocation7]  }
   0xe   : > { %s1504_s24 = scalar_select %p1201_p4, 1, 0 }
   0xf   : > { %s1505_s25 = scalar_select %p1206_p6, 1, 0 }
  0x10   : > { %p1211_p8 = pnand %p768_p5, %p175_p7  ;;  %s187_s28 = sshll.u32 %s1133_s27, 4  ;;  %s188_s28 = int_to_ptr.vmem [resolvable:$true] %s187_s28 }
  0x11   : > { %s1225_s30 = sadd.s32 1, %s1131_s21   ;;  %s31_s6 = sadd.s32 1, %s1127_s20 }
  0x12   : > { %s1506_s26 = scalar_select %p1211_p8, 1, 0 }
  0x13   : > { %p915_p9 = pneg %p1211_p8  ;;  %s28_s7 = ssub.s32 %s1131_s21, %s1225_s30 }
  0x14   : > { %s988_s8 = scalar_lea.vmem %s188_s28, 2048  ;;  %p996_p5 = scmp.lt.s32.totalorder %s188_s28, %s188_s28 }
  0x15   : > { %p1220_p11 = pnand %p915_p9, %p1499_p1  ;;  %p989_p13 = scmp.ne.s32.totalorder %s188_s28, %s988_s8 }
  0x16   : > { %p997_p7 = scmp.lt.s32.totalorder %s988_s8, %s988_s8 }
  0x17   : > { %p979_p12 = pneg %p1220_p11 }
  0x18   : > { %p998_p10 = por %p997_p7, %p996_p5 }
  0x19   : > { %p991_p0 = pnand %p989_p13, %p979_p12 }
  0x1b   : > { %p992_p3 = pneg %p991_p0 }
  0x1d   : > { %p999_p2 = pnand %p998_p10, %p992_p3 }
  0x1f   : > { %1002 = shalt.err (!%p999_p2)
}
  0x20   : > { %s1134_s9 = smov 128   ;;  %s1135_s10 = smov 8  }
  0x21   : > { %s1508_s2 = sld [smem:[#allocation14_spill]]  ;;  %p29_p9 = scmp.eq.s32.totalorder %s28_s7, 0 }
  0x22   : > { %p38_p12 = scmp.ne.s32.totalorder %s1127_s20, %s1123_s19  ;;  %p39_p10 = scmp.eq.s32.totalorder %s1131_s21, 0 }
  0x23   : > { %p931_p2 = scmp.lt.s32.totalorder %s1131_s21, 2  ;;  %p1510_p0 = scmp.eq.s32.totalorder %s1192_s22, 1 }
  0x24   : > { %s1242_s13 = scalar_select %p29_p9, %s1127_s20, %s31_s6  }
  0x25   : > { %p40_p13 = por %p39_p10, %p38_p12  ;;  %p1246_p3 = por %p1510_p0, %p38_p12 }
  0x26   : > { %1509 = sst [smem:[#allocation13_spill]] %s1242_s13  ;;  %s204_s15 = sand.u32 1, %s1127_s20  }
  0x27   : > { %918 = dma.hbm_to_vmem [thread:$0]  (!%p1220_p11), %s1508_s2, 2048, %s188_s28, [#allocation6], %s1134_s9, %s1134_s9, %s1135_s10  }
  0x28   : > { %s1511_s14 = scalar_select %p1246_p3, 1, 0 }
  0x29   : > { %s772_s16 = sshll.u32 %s1131_s21, 7  ;;  %s1252_s17 = sshll.u32 %s204_s15, 3 }
  0x2a   : > { %s1257_s28 = scalar_lea.hbm %s1493_s0, %s772_s16  ;;  %s208_s29 = scalar_lea.vmem [#allocation2], %s1252_s17 }
  0x2b   : > { %s215_s6 = sshll.u32 %s208_s29, 4  ;;  %p1260_p11 = pnand %p931_p2, %p40_p13  ;;  %s216_s6 = int_to_ptr.vmem [resolvable:$true] %s215_s6 }
  0x2c   : > { %s1267_s10 = scalar_lea.hbm %s1494_s1, %s772_s16  ;;  %s205_s11 = scalar_lea.sflag [#allocation3], %s204_s15 }
  0x2d   : > { %s1003_s12 = scalar_lea.hbm %s1257_s28, 128  ;;  %p1005_p7 = pneg %p1260_p11 }
  0x2e   : > { %p1004_p5 = scmp.ne.s32.totalorder %s1257_s28, %s1003_s12  ;;  %s1008_s29 = scalar_lea.hbm %s1493_s0, 256 }
  0x2f   : > { %p1009_p10 = scmp.lt.s32.totalorder %s1257_s28, %s1493_s0  ;;  %p1010_p2 = scmp.lt.s32.totalorder %s1008_s29, %s1003_s12 }
  0x30   : > { %p1006_p9 = pnand %p1005_p7, %p1004_p5 }
  0x31   : > { %p1011_p13 = por %p1010_p2, %p1009_p10 }
  0x32   : > { %p1007_p12 = pneg %p1006_p9 }
  0x34   : > { %p1012_p0 = pnand %p1011_p13, %p1007_p12 }
  0x36   : > { %1015 = shalt.err (!%p1012_p0)
}
  0x37   : > { %s1016_s15 = scalar_lea.vmem %s216_s6, 128  ;;  %s1136_s16 = smov [#allocation2]  }
  0x38   : > { %p1017_p1 = scmp.ne.s32.totalorder %s216_s6, %s1016_s15  ;;  %s1021_s8 = sshll.u32 %s1136_s16, 4  ;;  %s1022_s8 = int_to_ptr.vmem [resolvable:$false] %s1021_s8 }
  0x39   : > { %s1023_s9 = scalar_lea.vmem %s1022_s8, 256  ;;  %p1024_p9 = scmp.lt.s32.totalorder %s216_s6, %s1022_s8 }
  0x3a   : > { %p1019_p6 = pnand %p1017_p1, %p1005_p7  ;;  %p1025_p3 = scmp.lt.s32.totalorder %s1023_s9, %s1016_s15 }
  0x3c   : > { %p1020_p5 = pneg %p1019_p6  ;;  %p1026_p4 = por %p1025_p3, %p1024_p9 }
  0x3e   : > { %p1027_p8 = pnand %p1026_p4, %p1020_p5 }
  0x40   : > { %1030 = shalt.err (!%p1027_p8)
}
  0x41   : > { %922 = dma.hbm_to_vmem [thread:$0]  (!%p1260_p11), %s1257_s28, 128, %s216_s6, %s205_s11  }
  0x42   : > { %s222_s2 = sand.u32 1, %s1131_s21   ;;  %s226_s13 = scalar_lea.vmem [#allocation5], %s1252_s17 }
  0x43   : > { %s233_s12 = sshll.u32 %s226_s13, 4  ;;  %s223_s23 = scalar_lea.sflag [#allocation6], %s222_s2  ;;  %s234_s12 = int_to_ptr.vmem [resolvable:$true] %s233_s12 }
  0x44   : > { %s1031_s27 = scalar_lea.hbm %s1267_s10, 128  ;;  %s1036_s16 = scalar_lea.hbm %s1494_s1, 256 }
  0x45   : > { %p1032_p1 = scmp.ne.s32.totalorder %s1267_s10, %s1031_s27  ;;  %p1037_p8 = scmp.lt.s32.totalorder %s1267_s10, %s1494_s1 }
  0x46   : > { %p1038_p3 = scmp.lt.s32.totalorder %s1036_s16, %s1031_s27 }
  0x47   : > { %p1034_p4 = pnand %p1032_p1, %p1005_p7 }
  0x48   : > { %p1039_p12 = por %p1038_p3, %p1037_p8 }
  0x49   : > { %p1035_p6 = pneg %p1034_p4 }
  0x4b   : > { %p1040_p10 = pnand %p1039_p12, %p1035_p6 }
  0x4d   : > { %1043 = shalt.err (!%p1040_p10)
}
  0x4e   : > { %s1044_s17 = scalar_lea.vmem %s234_s12, 128  ;;  %s1137_s28 = smov [#allocation5]  }
  0x4f   : > { %p1045_p2 = scmp.ne.s32.totalorder %s234_s12, %s1044_s17  ;;  %s1049_s6 = sshll.u32 %s1137_s28, 4  ;;  %s1050_s6 = int_to_ptr.vmem [resolvable:$false] %s1049_s6 }
  0x50   : > { %s1051_s11 = scalar_lea.vmem %s1050_s6, 256  ;;  %p1052_p5 = scmp.lt.s32.totalorder %s234_s12, %s1050_s6 }
  0x51   : > { %p1047_p13 = pnand %p1045_p2, %p1005_p7  ;;  %p1053_p9 = scmp.lt.s32.totalorder %s1051_s11, %s1044_s17 }
  0x53   : > { %p1048_p0 = pneg %p1047_p13  ;;  %p1054_p1 = por %p1053_p9, %p1052_p5 }
  0x55   : > { %p1055_p4 = pnand %p1054_p1, %p1048_p0 }
  0x57   : > { %1058 = shalt.err (!%p1055_p4)
}
  0x58   : > { %925 = dma.hbm_to_vmem [thread:$0]  (!%p1260_p11), %s1267_s10, 128, %s234_s12, %s223_s23  }
  0x59   : > { %p1513_p6 = scmp.ne.s32.totalorder %s1506_s26, 0 }
  0x5a   : > { %s1312_s2 = sand.u32 (!%p1513_p6), 1, %s1123_s19   ;;  %p1514_p7 = scmp.ne.s32.totalorder (!%p1513_p6), %s1504_s24, 0 }
  0x5b   : > { %248 = sbr.rel (%p1513_p6) target bundleno = 1404 (0x57c), region = 40  ;;  %s1315_s13 = sshll.u32 (!%p1513_p6), %s1312_s2, 3 }
  0x5c   : > { %s251_s27 = scalar_lea.sflag (!%p1513_p6), [#allocation3], %s1312_s2  ;;  %s254_s29 = scalar_lea.vmem (!%p1513_p6), [#allocation2], %s1315_s13 }
  0x60   : > { %1102 = dma.done.wait (%p1514_p7), %s251_s27, 128  }
  0x61   : > { %1104 = vsyncadd (%p1514_p7), %s251_s27, 4294967168  ;;  %s259_s26 = sand.u32 1, %s1192_s22   ;;  %s263_s10 = scalar_lea.vmem [#allocation5], %s1315_s13 }
  0x62   : > { %s260_s7 = scalar_lea.sflag [#allocation6], %s259_s26 }
  0x63   : > { %1106 = dma.done.wait (%p1514_p7), %s260_s7, 128  }
  0x64   : > { %1108 = vsyncadd (%p1514_p7), %s260_s7, 4294967168  ;;  %p1515_p11 = scmp.eq.s32.totalorder %s1192_s22, 0 }
  0x66   : > { %1110 = dma.done.wait (%p1515_p11), [#allocation6], 2048   ;;  %p1516_p8 = pmov %p1515_p11 }
  0x67   : > { %v1138_v0 = vmov 0.0   ;;  %vm1139_vm0 = vmmov 0   ;;  %v1339_v1 = vld [vmem:[#allocation7 + $0x78] sm:$0xff]  ;;  %v1341_v2 = vld [vmem:[#allocation7 + $0x70] sm:$0xff]  ;;  %v1345_v3 = vld [vmem:[#allocation7 + $0x68] sm:$0xff]  ;;  %p302_p3 = scmp.lt.s32.totalorder %s1192_s22, 1 }
  0x68   : > { %1112 = vsyncadd (%p1516_p8), [#allocation6], 4294965248  ;;  %825 = vmatprep.subr.mxu0 %v1138_v0  ;;  %857 = vmatprep.mubr.msk.f32.mxu0 %vm1139_vm0, %v1138_v0  ;;  %v1349_v4 = vld [vmem:[#allocation7 + $0x60] sm:$0xff]  ;;  %v306_v5 = vld [vmem:[%s263_s10] sm:$0xff]  ;;  %vm478_vm1 = vcmask 64512   ;;  %s784_s9 = sshll.u32 %s1192_s22, 7 }
  0x69   : > { %865 = vmatprep.subr.mxu1 %v1138_v0  ;;  %867 = vmatprep.mubr.msk.f32.mxu1 %vm1139_vm0, %v1138_v0  ;;  %v1353_v6 = vld [vmem:[#allocation7 + $0x58] sm:$0xff]  ;;  %v1358_v7 = vld [vmem:[#allocation7 + $0x50] sm:$0xff]  ;;  %v1362_v8 = vld [vmem:[#allocation7 + $0x48] sm:$0xff]  ;;  %s303_s23 = scalar_select %p302_p3, %s1192_s22, 1 }
  0x6a   : > { %826 = vmatpush3.msra.mxu0 %v1339_v1  ;;  %866 = vmatpush3.msra.mxu1 %v306_v5  ;;  %v1366_v9 = vld [vmem:[#allocation7 + $0x40] sm:$0xff]  ;;  %v1370_v10 = vld [vmem:[#allocation7 + $0x38] sm:$0xff]  ;;  %v1374_v11 = vld [vmem:[#allocation7 + $0x30] sm:$0xff]  ;;  %s301_s17 = scalar_lea.vmem [#allocation8], %s1315_s13  ;;  %s654_s27 = scalar_lea.hbm %s1498_s5, %s784_s9 }
  0x6b   : > { %827 = vmatprep.subr.mxu0 %v1138_v0  ;;  %870 = vmatprep.subr.mxu1 %v1138_v0  ;;  %v1378_v12 = vld [vmem:[#allocation7 + $0x28] sm:$0xff]  ;;  %v1382_v13 = vld [vmem:[#allocation7 + $0x20] sm:$0xff]  ;;  %v1386_v14 = vld [vmem:[#allocation7 + $0x18] sm:$0xff]  ;;  %s304_s8 = scalar_lea.vmem %s1497_s4, %s303_s23  ;;  %s656_s28 = sshll.u32 %s301_s17, 4  ;;  %s657_s28 = int_to_ptr.vmem [resolvable:$true] %s656_s28 }
  0x6c   : > { %828 = vmatpush3.msra.mxu0 %v1341_v2  ;;  %v1390_v15 = vld [vmem:[#allocation7 + $0x10] sm:$0xff]  ;;  %v1394_v16 = vld [vmem:[#allocation7 + $0x8] sm:$0xff]  ;;  %v1398_v17 = vld [vmem:[#allocation7] sm:$0xff]  ;;  %s1059_s26 = scalar_lea.vmem %s657_s28, 128  ;;  %p1517_p10 = scmp.ne.s32.totalorder %s1511_s14, 0 }
  0x6d   : > { %829 = vmatprep.subr.mxu0 %v1138_v0  ;;  %v1409_v18 = vld [vmem:[%s1496_s3] ss:$0 sm:$0xff]  ;;  %p1060_p12 = scmp.ne.s32.totalorder %s657_s28, %s1059_s26  ;;  %s1140_s7 = smov [#allocation8]  }
  0x6e   : > { %830 = vmatpush3.msra.mxu0 %v1345_v3  ;;  %v305_v22 = vld [vmem:[%s254_s29] sm:$0xff]  ;;  %s643_s29 = scalar_lea.sflag [#allocation4], %s1312_s2  ;;  %s1063_s22 = sshll.u32 %s1140_s7, 4  ;;  %s1064_s22 = int_to_ptr.vmem [resolvable:$false] %s1063_s22 }
  0x6f   : > { %831 = vmatprep.subr.mxu0 %v1138_v0  ;;  %v781_v23 = vld [vmem:[%s304_s8] ss:$0 sm:$0xff]  ;;  %p1061_p2 = pnand %p1060_p12, %p1517_p10  ;;  %s1065_s13 = scalar_lea.vmem %s1064_s22, 256 }
  0x70   : > { %832 = vmatpush3.msra.mxu0 %v1349_v4  ;;  %p1066_p0 = scmp.lt.s32.totalorder %s657_s28, %s1064_s22  ;;  %p1067_p5 = scmp.lt.s32.totalorder %s1065_s13, %s1059_s26 }
  0x71   : > { %833 = vmatprep.subr.mxu0 %v1138_v0  ;;  %p1062_p13 = pneg %p1061_p2 }
  0x72   : > { %834 = vmatpush3.msra.mxu0 %v1353_v6  ;;  %p1068_p9 = por %p1067_p5, %p1066_p0 }
  0x73   : > { %835 = vmatprep.subr.mxu0 %v1138_v0 }
  0x74   : > { %836 = vmatpush3.msra.mxu0 %v1358_v7  ;;  %p1069_p1 = pnand %p1068_p9, %p1062_p13 }
  0x75   : > { %837 = vmatprep.subr.mxu0 %v1138_v0 }
  0x76   : > { %838 = vmatpush3.msra.mxu0 %v1362_v8 }
  0x77   : > { %839 = vmatprep.subr.mxu0 %v1138_v0 }
  0x78   : > { %840 = vmatpush3.msra.mxu0 %v1366_v9 }
  0x79   : > { %841 = vmatprep.subr.mxu0 %v1138_v0 }
  0x7a   : > { %842 = vmatpush3.msra.mxu0 %v1370_v10 }
  0x7b   : > { %843 = vmatprep.subr.mxu0 %v1138_v0 }
  0x7c   : > { %844 = vmatpush3.msra.mxu0 %v1374_v11 }
  0x7d   : > { %845 = vmatprep.subr.mxu0 %v1138_v0 }
  0x7e   : > { %846 = vmatpush3.msra.mxu0 %v1378_v12 }
  0x7f   : > { %847 = vmatprep.subr.mxu0 %v1138_v0 }
  0x80   : > { %848 = vmatpush3.msra.mxu0 %v1382_v13 }
  0x81   : > { %849 = vmatprep.subr.mxu0 %v1138_v0 }
  0x82   : > { %850 = vmatpush3.msra.mxu0 %v1386_v14 }
  0x83   : > { %851 = vmatprep.subr.mxu0 %v1138_v0 }
  0x84   : > { %852 = vmatpush3.msra.mxu0 %v1390_v15 }
  0x85   : > { %853 = vmatprep.subr.mxu0 %v1138_v0 }
  0x86   : > { %854 = vmatpush3.msra.mxu0 %v1394_v16 }
  0x87   : > { %855 = vmatprep.subr.mxu0 %v1138_v0 }
  0x88   : > { %856 = vmatpush3.msra.mxu0 %v1398_v17 }
  0x89   : > { %858 = vmatmul.mubr.f32.vlgmr.msra.gmra.mxu0 %v306_v5  ;;  %860 = vmatprep.subr.mxu0 %v1138_v0 }
  0x8a   : > { %862 = vmatprep.mubr.msk.f32.mxu0 %vm1139_vm0, %v1138_v0 }
 0x149   : > { %v397_v19 = vpop.f32.mrf.mxu0 }
 0x14a   : > { %v398_v20 = vadd.f32 %v1409_v18, %v397_v19 }
 0x14b   : > { %v859_v21 = vpop.f32.mrf.mxu0 }
 0x14c   : > { %861 = vmatpush3.xpose.msra.mxu0 %v398_v20 }
 0x14f   : > { %863 = vmatmul.mubr.f32.vlgmr.msra.gmra.mxu0 %v305_v22 }
 0x20f   : > { %v467_v24 = vpop.f32.mrf.mxu0 }
 0x210   : > { %v477_v25 = vmul.f32 %v781_v23, %v467_v24 }
 0x211   : > { %v864_v26 = vpop.f32.mrf.mxu0 }
 0x212   : > { %v479_v27 = vsel %vm478_vm1, %v477_v25, -inf }
 0x213   : > { %480 = vmax.xlane.f32.xlu0 %v479_v27 }
 0x29c   : > { %v481_v28 = vpop.xlane.xlu0 %480 }
 0x29d   : > { %v482_v29 = vsub.f32 %v477_v25, %v481_v28 }
 0x29f   : > { %v483_v30 = vmul.f32 1.442695, %v482_v29 }
 0x2a1   : > { %971 = vpow2.f32 %v483_v30 }
 0x2ae   : > { %v972_v31 = vpop.eup %971 }
 0x2af   : > { %v485_v32 = vsel %vm478_vm1, %v972_v31, 0.0 }
 0x2b0   : > { %486 = vadd.xlane.f32.xlu0 %v485_v32 }
 0x339   : > { %v487_v33 = vpop.xlane.xlu0 %486 }
 0x33a   : > { %973 = vrcp.f32 %v487_v33 }
 0x347   : > { %v974_v34 = vpop.eup %973 }
 0x348   : > { %v489_v35 = vmul.f32 %v974_v34, %v972_v31 }
 0x34a   : > { %v490_v36 = vmul.f32 %v781_v23, %v489_v35 }
 0x34c   : > { %v491_v37 = vsel %vm478_vm1, %v490_v36, 0.0 }
 0x34d   : > { %492 = vadd.xlane.f32.xlu1 %v491_v37 }
 0x3d6   : > { %v493_v38 = vpop.xlane.xlu1 %492 }
 0x3d7   : > { %v494_v39 = vadd.f32 1e-13, %v493_v38 }
 0x3d9   : > { %975 = vrcp.f32 %v494_v39 }
 0x3e6   : > { %v976_v40 = vpop.eup %975 }
 0x3e7   : > { %v496_v41 = vmul.f32 %v976_v40, %v490_v36 }
 0x3e9   : > { %868 = vmatmul.mubr.msk.f32.vlgmr.msra.gmra.mxu1 %vm478_vm1, %v496_v41 }
 0x3ea   : > { %871 = vmatpush3.msra.mxu1 %v1339_v1  ;;  %902 = vmatprep.mubr.msk.f32.mxu1 %vm1139_vm0, %v1138_v0 }
 0x3eb   : > { %872 = vmatprep.subr.mxu1 %v1138_v0 }
 0x3ec   : > { %873 = vmatpush3.msra.mxu1 %v1341_v2 }
 0x3ed   : > { %874 = vmatprep.subr.mxu1 %v1138_v0 }
 0x3ee   : > { %875 = vmatpush3.msra.mxu1 %v1345_v3 }
 0x3ef   : > { %876 = vmatprep.subr.mxu1 %v1138_v0 }
 0x3f0   : > { %877 = vmatpush3.msra.mxu1 %v1349_v4 }
 0x3f1   : > { %878 = vmatprep.subr.mxu1 %v1138_v0 }
 0x3f2   : > { %879 = vmatpush3.msra.mxu1 %v1353_v6 }
 0x3f3   : > { %880 = vmatprep.subr.mxu1 %v1138_v0 }
 0x3f4   : > { %881 = vmatpush3.msra.mxu1 %v1358_v7 }
 0x3f5   : > { %882 = vmatprep.subr.mxu1 %v1138_v0 }
 0x3f6   : > { %883 = vmatpush3.msra.mxu1 %v1362_v8 }
 0x3f7   : > { %884 = vmatprep.subr.mxu1 %v1138_v0 }
 0x3f8   : > { %885 = vmatpush3.msra.mxu1 %v1366_v9 }
 0x3f9   : > { %886 = vmatprep.subr.mxu1 %v1138_v0 }
 0x3fa   : > { %887 = vmatpush3.msra.mxu1 %v1370_v10 }
 0x3fb   : > { %888 = vmatprep.subr.mxu1 %v1138_v0 }
 0x3fc   : > { %889 = vmatpush3.msra.mxu1 %v1374_v11 }
 0x3fd   : > { %890 = vmatprep.subr.mxu1 %v1138_v0 }
 0x3fe   : > { %891 = vmatpush3.msra.mxu1 %v1378_v12 }
 0x3ff   : > { %892 = vmatprep.subr.mxu1 %v1138_v0 }
 0x400   : > { %893 = vmatpush3.msra.mxu1 %v1382_v13 }
 0x401   : > { %894 = vmatprep.subr.mxu1 %v1138_v0 }
 0x402   : > { %895 = vmatpush3.msra.mxu1 %v1386_v14 }
 0x403   : > { %896 = vmatprep.subr.mxu1 %v1138_v0 }
 0x404   : > { %897 = vmatpush3.msra.mxu1 %v1390_v15 }
 0x405   : > { %898 = vmatprep.subr.mxu1 %v1138_v0 }
 0x406   : > { %899 = vmatpush3.msra.mxu1 %v1394_v16 }
 0x407   : > { %900 = vmatprep.subr.mxu1 %v1138_v0 }
 0x408   : > { %901 = vmatpush3.msra.mxu1 %v1398_v17 }
 0x4a9   : > { %v566_v42 = vpop.f32.mrf.mxu1 }
 0x4aa   : > { %903 = vmatmul.mubr.f32.vlgmr.msra.gmra.mxu1 %v566_v42 }
 0x4ab   : > { %v869_v43 = vpop.f32.mrf.mxu1 }
 0x56a   : > { %v636_v44 = vpop.f32.mrf.mxu1 }
 0x56b   : > { %v637_v45 = vadd.f32 %v1409_v18, %v636_v44 }
 0x56c   : > { %v904_v46 = vpop.f32.mrf.mxu1 }
 0x56d   : > { %v640_v47 = vmax.f32 %v637_v45, 0.0 }
 0x56f   : > { %641 = vst [vmem:[%s301_s17] sm:$0xff] %v640_v47 }
 0x570   : > { %1072 = shalt.err (!%p1069_p1)
}
 0x571   : > { %s1073_s10 = scalar_lea.hbm %s654_s27, 128  ;;  %s1077_s12 = scalar_lea.hbm %s1498_s5, 256 }
 0x572   : > { %p1074_p4 = scmp.ne.s32.totalorder %s654_s27, %s1073_s10  ;;  %p1078_p11 = scmp.lt.s32.totalorder %s654_s27, %s1498_s5 }
 0x573   : > { %p1079_p8 = scmp.lt.s32.totalorder %s1077_s12, %s1073_s10 }
 0x574   : > { %p1075_p6 = pnand %p1074_p4, %p1517_p10 }
 0x575   : > { %p1080_p3 = por %p1079_p8, %p1078_p11 }
 0x576   : > { %p1076_p7 = pneg %p1075_p6 }
 0x578   : > { %p1081_p12 = pnand %p1080_p3, %p1076_p7 }
 0x57a   : > { %1084 = shalt.err (!%p1081_p12)
}
 0x57b   : > { %913 = dma.vmem_to_hbm [thread:$0]  (%p1517_p10), %s657_s28, 128, %s654_s27, %s643_s29  }
 0x57c PF: > { %s668_s16 = sand.u32 1, %s1119_s18   ;;  %p1518_p2 = scmp.ne.s32.totalorder %s1505_s25, 0 }
 0x57d   : > { %p1519_p13 = scmp.ge.s32.totalorder %s1131_s21, 2  ;;  %s669_s8 = scalar_lea.sflag [#allocation4], %s668_s16 }
 0x57f   : > { %p927_p0 = pnand %p1519_p13, %p1518_p2 }
 0x581   : > { %p928_p5 = pneg %p927_p0 }
 0x583   : > { %1114 = dma.done.wait (%p928_p5), %s669_s8, 128  }
 0x584   : > { %1116 = vsyncadd (%p928_p5), %s669_s8, 4294967168  ;;  %s1520_s9 = sld [smem:[#allocation13_spill]]  ;;  %p21_p9 = scmp.ge.s32.totalorder %s1225_s30, 4  }
 0x585   : > { %s1521_s18 = smov %s1123_s19  ;;  %s1522_s19 = smov %s1127_s20 }
 0x586   : > { %s1524_s21 = smov %s1225_s30  ;;  %23 = sbr.rel (!%p21_p9) target bundleno = 9 (0x9), region = 105 }
 0x58a   : > { %s1523_s20 = smov %s1520_s9 }
 0x58b   :  { %674 = vsyncpa [#allocation3], 1 }
 0x58c   :  { %676 = vsyncpa [#allocation3 + $0x1], 1 }
 0x58d   :  { %677 = vsyncpa [#allocation6], 1 }
 0x58e   :  { %679 = vsyncpa [#allocation6 + $0x1], 1 }
 0x58f   :  { %680 = vsyncpa [#allocation4], 1 }
 0x590   :  { %682 = vsyncpa [#allocation4 + $0x1], 1 }

</bundles_post_ra>
